<compile_context>
chip_gen: v5e
topology: v5e:2x2
jax: 0.10.0
libtpu: 0.0.40
codegen_flags: <defaults>
</compile_context>

<pallas_src>
import numpy as np
import jax
import jax.numpy as jnp
from jax import lax
from jax.experimental import pallas as pl
from jax.experimental.pallas import tpu as pltpu


def _attention_kernel(x_ref, w_ref, len_ref, rep_ref, att_ref):
    """One batch-block of the Attention forward.

    x_ref  : (Bb, T, H) f32 VMEM  -- input block (H on lanes, T on sublanes)
    w_ref  : (1, H)     f32 VMEM  -- attention weight vector
    len_ref: (Bb, 1)    i32 VMEM  -- sequence lengths for this block
    rep_ref: (Bb, H)    f32 VMEM  -- output representations (lane-dense)
    att_ref: (Bb, T)    f32 VMEM  -- output attentions (lane-dense)
    """
    x = x_ref[...]                                   # (Bb, T, H)
    w = w_ref[...]                                   # (1, H)
    lens = len_ref[...]                              # (Bb, 1) int32

    bb, t, _ = x_ref.shape

    # scores[b, t] = relu(<x[b, t, :], w>) : VPU multiply + XLU lane reduce.
    # Kept off the MXU on purpose (output width is a single column).
    scores = jnp.maximum(jnp.sum(x * w[jnp.newaxis], axis=2), 0.0)   # (Bb, T)

    # Numerically-stable softmax over T fused with the length mask and the
    # post-mask renormalization.  softmax -> mask -> renorm collapses to
    #   attn = (exp(s - max) * mask) / sum(exp(s - max) * mask)
    m = jnp.max(scores, axis=1, keepdims=True)                       # (Bb, 1)
    e = jnp.exp(scores - m)                                          # (Bb, T)
    t_idx = lax.broadcasted_iota(jnp.int32, (bb, t), 1)              # (Bb, T)
    masked = e * (t_idx < lens).astype(jnp.float32)                  # (Bb, T)
    denom = jnp.sum(masked, axis=1, keepdims=True)                   # (Bb, 1)
    # NOTE: approx=True would route this to the EUP slot, but its relative
    # error can exceed the 1e-5 test tolerance; approx=False stays exact.
    # Like the PyTorch reference, a zero-length row yields NaN here.
    attn = masked * pl.reciprocal(denom, approx=False)               # (Bb, T)

    # representations[b, h] = sum_t attn[b, t] * x[b, t, h]  (sublane reduce)
    rep = jnp.sum(x * attn[:, :, jnp.newaxis], axis=1)               # (Bb, H)

    rep_ref[...] = rep
    att_ref[...] = attn


def _choose_batch_block(B, T, H, vmem_budget_bytes=8 << 20):
    """Pick the batch block Bb.

    The double-buffered f32 input tile (2 * Bb * T * H * 4 B) is kept under a
    conservative budget that fits v5e's 16 MiB scoped-VMEM default and leaves
    ample headroom on v7x's 64 MiB physical VMEM.  Bb must either equal B or
    be a multiple of 8 that divides B (second-to-last-dim rule for the 2-D
    output blocks).
    """
    row_bytes = T * H * 4
    cap = max(1, vmem_budget_bytes // (2 * row_bytes))
    if B <= cap:
        return B
    bb = min(cap, 512)
    bb = (bb // 8) * 8
    while bb >= 8 and B % bb != 0:
        bb -= 8
    # Fallback: a single full-batch block (only hit for awkward B; may need a
    # larger vmem_limit_bytes in that case).
    return bb if bb >= 8 else B


def attention_pallas(inputs, lengths, att_weights, *, batch_block=None):
    """inputs: (B, T, H) f32, lengths: (B,) i32, att_weights: (1, H) f32.

    Returns (representations (B, H), attentions (B, T)).
    """
    B, T, H = inputs.shape
    bb = batch_block if batch_block is not None else _choose_batch_block(B, T, H)
    assert B % bb == 0, (B, bb)
    lengths_2d = lengths.astype(jnp.int32).reshape(B, 1)

    rep, att = pl.pallas_call(
        _attention_kernel,
        out_shape=(
            jax.ShapeDtypeStruct((B, H), jnp.float32),
            jax.ShapeDtypeStruct((B, T), jnp.float32),
        ),
        grid_spec=pltpu.PrefetchScalarGridSpec(
            num_scalar_prefetch=0,
            grid=(B // bb,),
            in_specs=[
                pl.BlockSpec((bb, T, H), lambda b: (b, 0, 0)),
                pl.BlockSpec((1, H), lambda b: (0, 0)),
                pl.BlockSpec((bb, 1), lambda b: (b, 0)),
            ],
            out_specs=[
                pl.BlockSpec((bb, H), lambda b: (b, 0)),
                pl.BlockSpec((bb, T), lambda b: (b, 0)),
            ],
        ),
        compiler_params=pltpu.CompilerParams(
            # Batch rows are fully independent: lets v7x shard the grid across
            # its two TensorCores; harmless on single-core v5e/v6e.
            dimension_semantics=("parallel",),
        ),
    )(inputs, att_weights, lengths_2d)
    return rep, att


def attention_ref(inputs, lengths, att_weights):
    """Pure-JAX reference mirroring the PyTorch forward."""
    B, T, H = inputs.shape
    scores = jnp.einsum('bth,h->bt', inputs, att_weights[0])
    scores = jnp.maximum(scores, 0.0)
    attn = jax.nn.softmax(scores, axis=-1)
    mask = (jnp.arange(T)[None, :] < lengths[:, None]).astype(inputs.dtype)
    masked = attn * mask
    attn = masked / masked.sum(-1, keepdims=True)
    rep = jnp.sum(inputs * attn[..., None], axis=1)
    return rep, attn


def _check(inputs, lengths, att_weights, **kw):
    rep, attn = attention_pallas(inputs, lengths, att_weights, **kw)
    jax.block_until_ready((rep, attn))
    rep_ref, attn_ref = attention_ref(inputs, lengths, att_weights)
    np.testing.assert_allclose(np.asarray(rep), np.asarray(rep_ref),
                               rtol=1e-5, atol=1e-5)
    np.testing.assert_allclose(np.asarray(attn), np.asarray(attn_ref),
                               rtol=1e-5, atol=1e-5)


if __name__ == "__main__":
    key = jax.random.PRNGKey(0)

    # Case 1: the module's nominal small shapes (single batch block, grid=(1,)).
    B, T, H = 2, 8, 32
    k1, k2, key = jax.random.split(key, 3)
    inputs = jax.random.normal(k1, (B, T, H), dtype=jnp.float32)
    lengths = jnp.array([T, T // 2], dtype=jnp.int32)
    stdv = 1.0 / np.sqrt(H)
    att_weights = jax.random.uniform(k2, (1, H), dtype=jnp.float32,
                                     minval=-stdv, maxval=stdv)
    _check(inputs, lengths, att_weights)

    # Case 2: exercises the batch-blocked multi-step grid (Bb=8, grid=(2,)).
    B, T, H = 16, 128, 128
    k1, k2, k3, key = jax.random.split(key, 4)
    inputs = jax.random.normal(k1, (B, T, H), dtype=jnp.float32)
    lengths = jax.random.randint(k2, (B,), 1, T + 1, dtype=jnp.int32)
    stdv = 1.0 / np.sqrt(H)
    att_weights = jax.random.uniform(k3, (1, H), dtype=jnp.float32,
                                     minval=-stdv, maxval=stdv)
    _check(inputs, lengths, att_weights, batch_block=8)

    print("KERNEL_OK")
</pallas_src>

<mosaic_0001>
module attributes {stable_mosaic.version = 11 : i64} {
  func.func @_attention_kernel(%arg0: i32, %arg1: memref<2x8x32xf32, #tpu.memory_space<vmem>>, %arg2: memref<1x32xf32, #tpu.memory_space<vmem>>, %arg3: memref<2x1xi32, #tpu.memory_space<vmem>>, %arg4: memref<2x32xf32, #tpu.memory_space<vmem>>, %arg5: memref<2x8xf32, #tpu.memory_space<vmem>>) attributes {dimension_semantics = [#tpu.dimension_semantics<parallel>], iteration_bounds = array<i64: 1>, scalar_prefetch = 0 : i64, scratch_operands = 0 : i64, tpu.core_type = #tpu.core_type<tc>, window_params = [{transform_indices = @transform_0, window_bounds = array<i64: 2, 8, 32>}, {pipeline_mode = #tpu.pipeline_mode<synchronous>, transform_indices = @transform_1, window_bounds = array<i64: 1, 32>}, {transform_indices = @transform_2, window_bounds = array<i64: 2, 1>}, {transform_indices = @transform_3, window_bounds = array<i64: 2, 32>}, {transform_indices = @transform_4, window_bounds = array<i64: 2, 8>}]} {
    %c0 = arith.constant 0 : index
    %c0_0 = arith.constant 0 : index
    %c0_1 = arith.constant 0 : index
    %0 = vector.load %arg1[%c0, %c0_0, %c0_1] : memref<2x8x32xf32, #tpu.memory_space<vmem>>, vector<2x8x32xf32>
    %c0_2 = arith.constant 0 : index
    %c0_3 = arith.constant 0 : index
    %1 = vector.load %arg2[%c0_2, %c0_3] : memref<1x32xf32, #tpu.memory_space<vmem>>, vector<1x32xf32>
    %c0_4 = arith.constant 0 : index
    %c0_5 = arith.constant 0 : index
    %2 = vector.load %arg3[%c0_4, %c0_5] : memref<2x1xi32, #tpu.memory_space<vmem>>, vector<2x1xi32>
    %3 = vector.shape_cast %1 : vector<1x32xf32> to vector<1x1x32xf32>
    %4 = vector.broadcast %3 : vector<1x1x32xf32> to vector<2x8x32xf32>
    %5 = arith.mulf %0, %4 : vector<2x8x32xf32>
    %cst = arith.constant dense<0.000000e+00> : vector<2x8xf32>
    %6 = vector.multi_reduction <add>, %5, %cst [2] : vector<2x8x32xf32> to vector<2x8xf32>
    %cst_6 = arith.constant 0.000000e+00 : f32
    %7 = vector.broadcast %cst_6 : f32 to vector<2x8xf32>
    %8 = arith.maximumf %6, %7 : vector<2x8xf32>
    %cst_7 = arith.constant dense<0xFF800000> : vector<2xf32>
    %9 = vector.multi_reduction <maximumf>, %8, %cst_7 [1] : vector<2x8xf32> to vector<2xf32>
    %10 = vector.shape_cast %9 : vector<2xf32> to vector<2x1xf32>
    %11 = vector.broadcast %10 : vector<2x1xf32> to vector<2x8xf32>
    %12 = arith.subf %8, %11 : vector<2x8xf32>
    %13 = math.exp %12 : vector<2x8xf32>
    %14 = tpu.iota {dimensions = array<i32: 1>} : vector<2x8xi32>
    %15 = vector.broadcast %2 : vector<2x1xi32> to vector<2x8xi32>
    %16 = arith.cmpi slt, %14, %15 : vector<2x8xi32>
    %17 = arith.extui %16 : vector<2x8xi1> to vector<2x8xi32>
    %18 = arith.sitofp %17 : vector<2x8xi32> to vector<2x8xf32>
    %19 = arith.mulf %13, %18 : vector<2x8xf32>
    %cst_8 = arith.constant dense<0.000000e+00> : vector<2xf32>
    %20 = vector.multi_reduction <add>, %19, %cst_8 [1] : vector<2x8xf32> to vector<2xf32>
    %21 = vector.shape_cast %20 : vector<2xf32> to vector<2x1xf32>
    %22 = tpu.reciprocal %21 : vector<2x1xf32> -> vector<2x1xf32>
    %23 = vector.broadcast %22 : vector<2x1xf32> to vector<2x8xf32>
    %24 = arith.mulf %19, %23 : vector<2x8xf32>
    %25 = vector.shape_cast %24 : vector<2x8xf32> to vector<2x8x1xf32>
    %26 = vector.broadcast %25 : vector<2x8x1xf32> to vector<2x8x32xf32>
    %27 = arith.mulf %0, %26 : vector<2x8x32xf32>
    %cst_9 = arith.constant dense<0.000000e+00> : vector<2x32xf32>
    %28 = vector.multi_reduction <add>, %27, %cst_9 [1] : vector<2x8x32xf32> to vector<2x32xf32>
    %c0_10 = arith.constant 0 : index
    %c0_11 = arith.constant 0 : index
    %29 = vector.load %arg4[%c0_10, %c0_11] : memref<2x32xf32, #tpu.memory_space<vmem>>, vector<2x32xf32>
    tpu.vector_store %arg4[%c0_10, %c0_11], %28 {strides = array<i32>} : memref<2x32xf32, #tpu.memory_space<vmem>>, vector<2x32xf32>,
    %c0_12 = arith.constant 0 : index
    %c0_13 = arith.constant 0 : index
    %30 = vector.load %arg5[%c0_12, %c0_13] : memref<2x8xf32, #tpu.memory_space<vmem>>, vector<2x8xf32>
    tpu.vector_store %arg5[%c0_12, %c0_13], %24 {strides = array<i32>} : memref<2x8xf32, #tpu.memory_space<vmem>>, vector<2x8xf32>,
    return
  }
  func.func @transform_0(%arg0: i32) -> (i32, i32, i32) {
    %c0_i32 = arith.constant 0 : i32
    %c0_i32_0 = arith.constant 0 : i32
    %c0_i32_1 = arith.constant 0 : i32
    return %arg0, %c0_i32, %c0_i32_0 : i32, i32, i32
  }
  func.func @transform_1(%arg0: i32) -> (i32, i32) {
    %c0_i32 = arith.constant 0 : i32
    %c0_i32_0 = arith.constant 0 : i32
    %c0_i32_1 = arith.constant 0 : i32
    return %c0_i32, %c0_i32_0 : i32, i32
  }
  func.func @transform_2(%arg0: i32) -> (i32, i32) {
    %c0_i32 = arith.constant 0 : i32
    %c0_i32_0 = arith.constant 0 : i32
    return %arg0, %c0_i32 : i32, i32
  }
  func.func @transform_3(%arg0: i32) -> (i32, i32) {
    %c0_i32 = arith.constant 0 : i32
    %c0_i32_0 = arith.constant 0 : i32
    return %arg0, %c0_i32 : i32, i32
  }
  func.func @transform_4(%arg0: i32) -> (i32, i32) {
    %c0_i32 = arith.constant 0 : i32
    %c0_i32_0 = arith.constant 0 : i32
    return %arg0, %c0_i32 : i32, i32
  }
}

</mosaic_0001>

<bundles_post_ra>
// kernel: tpu_custom_call.1
= control target key start
LH: loop header
LB: loop body
LE: loop exit
PB: predicated region body
PF: predicated region fallthrough
CT: control target
= control target key end

     0   :  { %10 = vsyncpa [#allocation3], 0  ;;  %s384_s0 = inlined_call_operand.hbm [shape: f32[2,8,32], index: 0, kind: input, shape index: {}]   ;;  %s385_s1 = inlined_call_operand.vmem [shape: f32[1,32], index: 1, kind: input, shape index: {}]   ;;  %s386_s2 = inlined_call_operand.vmem [shape: s32[2,1], index: 2, kind: input, shape index: {}]   ;;  %s387_s3 = inlined_call_operand.hbm [shape: f32[2,32], index: 3, kind: output, shape index: {0}]   ;;  %s388_s4 = inlined_call_operand.hbm [shape: f32[2,8], index: 4, kind: output, shape index: {1}]  }
   0x1   :  { %11 = vsyncpa [#allocation4], 0 }
   0x2   :  { %12 = vsyncpa [#allocation7], 0  ;;  %s17_s17 = sshll.u32 %s384_s0, 4  ;;  %s309_s18 = smov [#allocation2]   ;;  %s18_s17 = int_to_ptr.hbm [resolvable:$true] %s17_s17 }
   0x3   :  { %s19_s19 = sshll.u32 %s309_s18, 4  ;;  %s310_s20 = smov 128   ;;  %s20_s19 = int_to_ptr.vmem [resolvable:$true] %s19_s19 }
   0x4   :  { %s311_s21 = smov 8  }
   0x5   :  { %25 = dma.hbm_to_vmem [thread:$0]  %s18_s17, 256, %s20_s19, [#allocation3], %s310_s20, %s310_s20, %s311_s21  }
   0x6   :  { %303 = dma.done.wait [#allocation3], 256  }
   0x7   :  { %304 = vsyncadd [#allocation3], 4294967040  ;;  %v312_v0 = vmov 0   ;;  %v344_v1 = vld [vmem:[#allocation2] sm:$0xff]  ;;  %vm43_vm0 = vcmask 261120   ;;  %v353_v5 = vld [vmem:[#allocation2 + $0x8] sm:$0xff]  ;;  %v54_v9 = vlaneseq }
   0x8   :  { %215 = vset.pattern.permute.xlu1 %v312_v0  ;;  %223 = vset.pattern.permute.xlu0 %v312_v0  ;;  %v224_v2 = vld [vmem:[%s385_s1] ss:$0 sm:$0xff]  ;;  %v313_v13 = vmov 0.0   ;;  %vm58_vm2 = vcmask 1041409   ;;  %vm61_vm3 = vcmask 58368   ;;  %s314_s1 = smov [#allocation6]  }
   0x9   :  { %v37_v3 = vld [vmem:[%s386_s2] sm:$0x3]  ;;  %v41_v4 = vmul.f32 %v224_v2, %v344_v1  ;;  %v42_v7 = vmul.f32 %v224_v2, %v353_v5  ;;  %v85_v10 = vshrl.u32 %v54_v9, 7  ;;  %v358_v11 = vand.u32 127, %v54_v9  ;;  %s190_s2 = sshll.u32 %s314_s1, 4  ;;  %s192_s27 = sshll.u32 %s388_s4, 4  ;;  %s191_s2 = int_to_ptr.vmem [resolvable:$true] %s190_s2  ;;  %s193_s27 = int_to_ptr.hbm [resolvable:$true] %s192_s27 }
   0xa   :  { %77 = vperm.xlu1 %215, %v37_v3   ;;  %s315_s4 = smov [#allocation5]   ;;  %s181_s5 = sshll.u32 %s387_s3, 4  ;;  %vm167_vm8 = vcmask 254976   ;;  %s182_s5 = int_to_ptr.hbm [resolvable:$true] %s181_s5 }
   0xb   :  { %v44_v6 = vsel %vm43_vm0, %v41_v4, 0.0  ;;  %v47_v8 = vsel %vm43_vm0, %v42_v7, 0.0  ;;  %216 = vset.pattern.permute.xlu2 %v85_v10  ;;  %s179_s28 = sshll.u32 %s315_s4, 4  ;;  %s180_s28 = int_to_ptr.vmem [resolvable:$true] %s179_s28 }
   0xc   :  { %45 = vadd.xlane.f32.xlu0 %v44_v6 }
  0x14   :  { %48 = vadd.xlane.f32.xlu0 %v47_v8 }
  0x7c   :  { %v78_v12 = vpop.permute.xlu1 %77 }
  0x7d   :  { %vm79_vm1 = vcmp.lt.s32.totalorder %v358_v11, %v78_v12 }
  0x7e   :  { %v207_v14 = vsel %vm79_vm1, 1.0, %v313_v13 }
  0x7f   :  { %v83_v15 = vperm.slane %v207_v14, 0  ;;  %v90_v16 = vperm.slane %v207_v14, 1  ;;  %v46_v17 = vpop.xlane.xlu0 %45 }
  0x80   :  { %v50_v19 = vmax.f32 %v46_v17, 0.0 }
  0x81   :  { %v217_v18 = vpack.i.bf16 %v90_v16, %v83_v15 }
  0x82   :  { %v56_v22 = vperm.slane %v50_v19, %v358_v11 }
  0x83   :  { %218 = vperm.xlu2 %216, %v217_v18  }
  0x87   :  { %v49_v20 = vpop.xlane.xlu0 %48 }
  0x88   :  { %v51_v21 = vmax.f32 %v49_v20, 0.0 }
  0x8a   :  { %v57_v23 = vperm.slane %v51_v21, %v358_v11 }
  0x8b   :  { %222 = vset.pattern.permute.xlu2 %v312_v0 }
  0x8c   :  { %v59_v24 = vsel %vm58_vm2, %v57_v23, %v56_v22 }
  0x8d   :  { %v62_v25 = vsel %vm61_vm3, %v59_v24, -inf }
  0x8e   :  { %63 = vmax.xlane.f32.xlu1 %v62_v25 }
  0xdd   :  { %v219_v33 = vpop.permute.xlu2 %218 }
  0xde   :  { %v220_v34 = vunpack.i.l.bf16 %v219_v33  ;;  %v221_v35 = vunpack.i.h.bf16 %v219_v33 }
 0x101   :  { %v64_v26 = vpop.xlane.xlu1 %63 }
 0x102   :  { %v66_v27 = vperm.slane %v64_v26, 0  ;;  %v67_v28 = vperm.slane %v64_v26, 1 }
 0x104   :  { %v70_v29 = vsub.f32 %v50_v19, %v66_v27  ;;  %v71_v30 = vsub.f32 %v51_v21, %v67_v28 }
 0x106   :  { %v72_v31 = vmul.f32 1.442695, %v70_v29  ;;  %v74_v32 = vmul.f32 1.442695, %v71_v30 }
 0x108   :  { %225 = vpow2.f32 %v72_v31 }
 0x109   :  { %227 = vpow2.f32 %v74_v32 }
 0x10e   :  { %v226_v36 = vpop.eup %225 }
 0x10f   :  { %v228_v37 = vpop.eup %227  ;;  %v99_v38 = vmul.f32 %v226_v36, %v220_v34 }
 0x110   :  { %v100_v39 = vmul.f32 %v228_v37, %v221_v35 }
 0x111   :  { %104 = vperm.xlu2 %222, %v99_v38  }
 0x112   :  { %107 = vperm.xlu0 %223, %v100_v39  }
 0x16b   :  { %v105_v40 = vpop.permute.xlu2 %104 }
 0x16c   :  { %v109_v42 = vperm.slane %v105_v40, %v358_v11 }
 0x184   :  { %v108_v41 = vpop.permute.xlu0 %107 }
 0x185   :  { %v110_v43 = vperm.slane %v108_v41, %v358_v11 }
 0x187   :  { %v111_v44 = vsel %vm58_vm2, %v110_v43, %v109_v42 }
 0x188   :  { %v113_v45 = vsel %vm61_vm3, %v111_v44, 0.0 }
 0x189   :  { %114 = vadd.xlane.f32.xlu2 %v113_v45 }
 0x1fc   :  { %v115_v46 = vpop.xlane.xlu2 %114 }
 0x1fd   :  { %229 = vrcp.f32 %v115_v46  ;;  %v127_v50 = vand.u32 2147483648, %v115_v46  ;;  %v125_v52 = vand.u32 2147483647, %v115_v46  ;;  %vm121_vm5 = vweird.f32 %v115_v46 }
 0x1ff   :  { %v128_v54 = vor.u32 1.1754944e-38, %v127_v50  ;;  %vm126_vm7 = vcmp.eq.f32.partialorder %v125_v52, 8.507059e+37 }
 0x203   :  { %v230_v47 = vpop.eup %229 }
 0x204   :  { %v117_v48 = vmul.f32 %v230_v47, %v115_v46  ;;  %vm122_vm4 = vweird.f32 %v230_v47 }
 0x205   :  { %vm123_vm6 = vmor %vm121_vm5, %vm122_vm4 }
 0x206   :  { %v118_v49 = vsub.f32 1.0, %v117_v48 }
 0x208   :  { %v119_v51 = vmul.f32 %v230_v47, %v118_v49 }
 0x20a   :  { %v120_v53 = vadd.f32 %v230_v47, %v119_v51 }
 0x20c   :  { %v124_v55 = vsel %vm123_vm6, %v230_v47, %v120_v53 }
 0x20d   :  { %v129_v56 = vsel %vm126_vm7, %v128_v54, %v124_v55 }
 0x20e   :  { %v132_v57 = vperm.slane %v129_v56, 1  ;;  %v131_v58 = vperm.slane %v129_v56, 0 }
 0x210   :  { %v136_v59 = vmul.f32 %v132_v57, %v100_v39  ;;  %v135_v60 = vmul.f32 %v131_v58, %v99_v38 }
 0x212   :  { %144 = vperm.xlu0 %223, %v136_v59   ;;  %139 = vperm.xlu1 %215, %v135_v60  }
 0x284   :  { %v145_v61 = vpop.permute.xlu0 %144  ;;  %v140_v62 = vpop.permute.xlu1 %139 }
 0x285   :  { %v148_v63 = vmul.f32 %v145_v61, %v353_v5  ;;  %v170_v0 = vperm.slane %v145_v61, %v358_v11  ;;  %v147_v2 = vmul.f32 %v140_v62, %v344_v1  ;;  %v169_v3 = vperm.slane %v140_v62, %v358_v11 }
 0x287   :  { %v156_v4 = vsel %vm43_vm0, %v148_v63, 0.0  ;;  %v149_v6 = vsel %vm43_vm0, %v147_v2, 0.0  ;;  %v171_v7 = vsel %vm58_vm2, %v170_v0, %v169_v3 }
 0x288   :  { %v157_v8 = vrot.slane %v156_v4, 4  ;;  %v150_v9 = vrot.slane %v149_v6, 4  ;;  %173 = vst.msk [vmem:[#allocation6] sm:$0x3] %vm61_vm3, %v171_v7 }
 0x289   :  { %195 = dma.vmem_to_hbm [thread:$0]  %s191_s2, 32, %s193_s27, [#allocation7]  }
 0x28a   :  { %v158_v5 = vadd.f32 %v157_v8, %v156_v4  ;;  %v151_v10 = vadd.f32 %v150_v9, %v149_v6 }
 0x28c   :  { %v159_v12 = vrot.slane %v158_v5, 2  ;;  %v152_v13 = vrot.slane %v151_v10, 2 }
 0x28e   :  { %v160_v1 = vadd.f32 %v159_v12, %v158_v5  ;;  %v153_v14 = vadd.f32 %v152_v13, %v151_v10 }
 0x290   :  { %v161_v11 = vrot.slane %v160_v1, 1  ;;  %v154_v15 = vrot.slane %v153_v14, 1 }
 0x292   :  { %v162_v16 = vadd.f32 %v161_v11, %v160_v1  ;;  %v155_v17 = vadd.f32 %v154_v15, %v153_v14 }
 0x294   :  { %v165_v18 = vsel %vm58_vm2, %v162_v16, %v155_v17 }
 0x295   :  { %168 = vst.msk [vmem:[#allocation5] sm:$0x3] %vm167_vm8, %v165_v18 }
 0x296   :  { %184 = dma.vmem_to_hbm [thread:$0]  %s180_s28, 32, %s182_s5, [#allocation4]  }
 0x297   :  { %305 = dma.done.wait [#allocation4], 32  }
 0x298   :  { %306 = vsyncadd [#allocation4], 4294967264 }
 0x299   :  { %307 = dma.done.wait [#allocation7], 32  }
 0x29a   :  { %308 = vsyncadd [#allocation7], 4294967264 }
 0x29b   :  { %204 = vsyncpa [#allocation3], 1 }
 0x29c   :  { %205 = vsyncpa [#allocation4], 1 }
 0x29d   :  { %206 = vsyncpa [#allocation7], 1 }

</bundles_post_ra>
